<compile_context>
chip_gen: v5e
topology: v5e:2x2
jax: 0.10.0
libtpu: 0.0.40
codegen_flags: <defaults>
</compile_context>

<pallas_src>
import functools

import jax
import jax.numpy as jnp
from jax import lax
from jax.experimental import pallas as pl
from jax.experimental.pallas import tpu as pltpu

H1, H2 = 50, 30      # hidden sizes fixed by the PyTorch module
LANE = 128           # lane-pad target for all feature dims
MAX_TILE_B = 512     # batch tile (amortizes ~0.35us/step grid overhead)


def _round_up(n, m):
    return ((n + m - 1) // m) * m


def _hash_keep_mask(shape, seed_u32):
    """Per-element p=0.5 Bernoulli keep-mask from a splitmix32-style hash.

    Pure uint32 VPU ops -> lowers on TPU and in interpret mode.
    """
    rows = lax.broadcasted_iota(jnp.int32, shape, 0).astype(jnp.uint32)
    cols = lax.broadcasted_iota(jnp.int32, shape, 1).astype(jnp.uint32)
    h = seed_u32 + rows * jnp.uint32(shape[1]) + cols
    h = (h ^ (h >> 16)) * jnp.uint32(0x7FEB352D)
    h = (h ^ (h >> 15)) * jnp.uint32(0x846CA68B)
    h = h ^ (h >> 16)
    return (h & jnp.uint32(1)) == jnp.uint32(1)


def mlp_kernel(seed_ref,                                            # SMEM scalar
               x_ref, w1_ref, b1_ref, w2_ref, b2_ref, w3_ref, b3_ref,  # inputs
               o_ref):                                              # output
    x = x_ref[...]

    # linear1 + ReLU  (padded lanes stay exactly 0: W/b pads are 0, relu(0)=0)
    h1 = jnp.dot(x, w1_ref[...], preferred_element_type=jnp.float32) + b1_ref[...]
    h1 = jnp.maximum(h1, 0.0)

    # F.dropout(output): p=0.5, training=True -> keep w.p. 0.5, scale by 2.
    # Seed is mixed with the grid step so every batch tile gets its own mask.
    tile_seed = (seed_ref[0].astype(jnp.uint32)
                 + pl.program_id(0).astype(jnp.uint32) * jnp.uint32(0x9E3779B1))
    keep = _hash_keep_mask(h1.shape, tile_seed)       # full padded (TILE_B,128) draw
    h1 = jnp.where(keep, h1 * 2.0, 0.0)

    # linear2 + ReLU
    h2 = jnp.dot(h1, w2_ref[...], preferred_element_type=jnp.float32) + b2_ref[...]
    h2 = jnp.maximum(h2, 0.0)

    # linear3 (no activation); lane-dense (TILE_B, 128) store
    o_ref[...] = jnp.dot(h2, w3_ref[...], preferred_element_type=jnp.float32) + b3_ref[...]


def _pad2(a, rows, cols):
    return jnp.pad(a, ((0, rows - a.shape[0]), (0, cols - a.shape[1])))


@jax.jit
def mlp_forward(x, w1, b1, w2, b2, w3, b3, seed):
    # input.view(B, -1)
    B = x.shape[0]
    x2d = x.reshape(B, -1).astype(jnp.float32)
    in_dim = x2d.shape[1]
    out_dim = w3.shape[1]

    # Lane-pad all feature dims to 128; zero-pad so math is unchanged.
    in_pad = _round_up(in_dim, LANE)
    w1p = _pad2(w1.astype(jnp.float32), in_pad, LANE)
    b1p = _pad2(b1.astype(jnp.float32), 1, LANE)
    w2p = _pad2(w2.astype(jnp.float32), LANE, LANE)
    b2p = _pad2(b2.astype(jnp.float32), 1, LANE)
    w3p = _pad2(w3.astype(jnp.float32), LANE, LANE)
    b3p = _pad2(b3.astype(jnp.float32), 1, LANE)

    # Batch tiling: sublane-align, cap tile at MAX_TILE_B, pad batch to a
    # multiple of the tile (zero rows, sliced off below).
    tile_b = min(MAX_TILE_B, _round_up(B, 8))
    b_pad = _round_up(B, tile_b)
    x2d = _pad2(x2d, b_pad, in_pad)
    n_tiles = b_pad // tile_b

    # NOTE: at large batch, casting x / weights to bf16 (keeping f32 MXU
    # accumulation) halves DMA bytes on v6e/v7x; kept f32 here for fidelity
    # with the PyTorch reference at these tiny shapes.
    grid_spec = pltpu.PrefetchScalarGridSpec(
        num_scalar_prefetch=1,                       # seed -> SMEM
        grid=(n_tiles,),
        in_specs=[
            pl.BlockSpec((tile_b, in_pad), lambda i, s: (i, 0)),
            pl.BlockSpec((in_pad, LANE),   lambda i, s: (0, 0)),
            pl.BlockSpec((1, LANE),        lambda i, s: (0, 0)),
            pl.BlockSpec((LANE, LANE),     lambda i, s: (0, 0)),
            pl.BlockSpec((1, LANE),        lambda i, s: (0, 0)),
            pl.BlockSpec((LANE, LANE),     lambda i, s: (0, 0)),
            pl.BlockSpec((1, LANE),        lambda i, s: (0, 0)),
        ],
        out_specs=pl.BlockSpec((tile_b, LANE), lambda i, s: (i, 0)),
    )

    out_padded = pl.pallas_call(
        mlp_kernel,
        out_shape=jax.ShapeDtypeStruct((b_pad, LANE), jnp.float32),
        grid_spec=grid_spec,
        compiler_params=pltpu.CompilerParams(
            dimension_semantics=("parallel",)),      # shard batch tiles on v7x
    )(seed, x2d, w1p, b1p, w2p, b2p, w3p, b3p)

    return out_padded[:B, :out_dim]


def init_params(key, input_dim, output_dim):
    """Deterministic init matching the nn.Linear shapes (stored as [in, out])."""
    ks = jax.random.split(key, 6)

    def lin(kw, kb, fan_in, fan_out):
        bound = 1.0 / jnp.sqrt(fan_in)
        w = jax.random.uniform(kw, (fan_in, fan_out), jnp.float32, -bound, bound)
        b = jax.random.uniform(kb, (1, fan_out), jnp.float32, -bound, bound)
        return w, b

    w1, b1 = lin(ks[0], ks[1], input_dim, H1)
    w2, b2 = lin(ks[2], ks[3], H1, H2)
    w3, b3 = lin(ks[4], ks[5], H2, output_dim)
    return w1, b1, w2, b2, w3, b3


if __name__ == "__main__":
    key = jax.random.PRNGKey(0)
    k_x, k_p = jax.random.split(key)

    # args = {'input_dim': 64, 'output_dim': 10}; input (8, 4, 4, 4) is
    # flattened to (8, 64) by forward()'s .view(B, -1).
    B, input_dim, output_dim = 8, 64, 10
    x = jax.random.normal(k_x, (B, 4, 4, 4), dtype=jnp.float32)

    w1, b1, w2, b2, w3, b3 = init_params(k_p, input_dim, output_dim)
    seed = jnp.array([0], dtype=jnp.int32)    # deterministic dropout seed

    out = mlp_forward(x, w1, b1, w2, b2, w3, b3, seed)
    out = jax.block_until_ready(out)
    assert out.shape == (B, output_dim)
    assert bool(jnp.all(jnp.isfinite(out)))
    print("KERNEL_OK")
</pallas_src>

<mosaic_0001>
module attributes {stable_mosaic.version = 11 : i64} {
  func.func @mlp_kernel(%arg0: i32, %arg1: memref<1xi32, #tpu.memory_space<smem>>, %arg2: memref<8x128xf32, #tpu.memory_space<vmem>>, %arg3: memref<128x128xf32, #tpu.memory_space<vmem>>, %arg4: memref<1x128xf32, #tpu.memory_space<vmem>>, %arg5: memref<128x128xf32, #tpu.memory_space<vmem>>, %arg6: memref<1x128xf32, #tpu.memory_space<vmem>>, %arg7: memref<128x128xf32, #tpu.memory_space<vmem>>, %arg8: memref<1x128xf32, #tpu.memory_space<vmem>>, %arg9: memref<8x128xf32, #tpu.memory_space<vmem>>) attributes {dimension_semantics = [#tpu.dimension_semantics<parallel>], iteration_bounds = array<i64: 1>, scalar_prefetch = 1 : i64, scratch_operands = 0 : i64, tpu.core_type = #tpu.core_type<tc>, window_params = [{transform_indices = @transform_0, window_bounds = array<i64: 8, 128>}, {pipeline_mode = #tpu.pipeline_mode<synchronous>, transform_indices = @transform_1, window_bounds = array<i64: 128, 128>}, {pipeline_mode = #tpu.pipeline_mode<synchronous>, transform_indices = @transform_2, window_bounds = array<i64: 1, 128>}, {pipeline_mode = #tpu.pipeline_mode<synchronous>, transform_indices = @transform_3, window_bounds = array<i64: 128, 128>}, {pipeline_mode = #tpu.pipeline_mode<synchronous>, transform_indices = @transform_4, window_bounds = array<i64: 1, 128>}, {pipeline_mode = #tpu.pipeline_mode<synchronous>, transform_indices = @transform_5, window_bounds = array<i64: 128, 128>}, {pipeline_mode = #tpu.pipeline_mode<synchronous>, transform_indices = @transform_6, window_bounds = array<i64: 1, 128>}, {transform_indices = @transform_7, window_bounds = array<i64: 8, 128>}]} {
    %c0 = arith.constant 0 : index
    %c0_0 = arith.constant 0 : index
    %0 = vector.load %arg2[%c0, %c0_0] : memref<8x128xf32, #tpu.memory_space<vmem>>, vector<8x128xf32>
    %c0_1 = arith.constant 0 : index
    %c0_2 = arith.constant 0 : index
    %1 = vector.load %arg3[%c0_1, %c0_2] : memref<128x128xf32, #tpu.memory_space<vmem>>, vector<128x128xf32>
    %cst = arith.constant dense<0.000000e+00> : vector<8x128xf32>
    %2 = tpu.matmul %0, %1, %cst {dimension_numbers = #tpu.dot_dimension_numbers<[1], [0], [0], [1], [0, 0, 1, 1], [], []>} : vector<8x128xf32>, vector<128x128xf32>, vector<8x128xf32> -> vector<8x128xf32>
    %c0_3 = arith.constant 0 : index
    %c0_4 = arith.constant 0 : index
    %3 = vector.load %arg4[%c0_3, %c0_4] : memref<1x128xf32, #tpu.memory_space<vmem>>, vector<1x128xf32>
    %4 = vector.broadcast %3 : vector<1x128xf32> to vector<8x128xf32>
    %5 = arith.addf %2, %4 : vector<8x128xf32>
    %cst_5 = arith.constant 0.000000e+00 : f32
    %6 = vector.broadcast %cst_5 : f32 to vector<8x128xf32>
    %7 = arith.maximumf %5, %6 : vector<8x128xf32>
    %c0_6 = arith.constant 0 : index
    %8 = memref.load %arg1[%c0_6] : memref<1xi32, #tpu.memory_space<smem>>
    %c-1640531535_i32 = arith.constant -1640531535 : i32
    %9 = arith.muli %arg0, %c-1640531535_i32 : i32
    %10 = arith.addi %8, %9 : i32
    %11 = tpu.iota {dimensions = array<i32: 0>} : vector<8x128xi32>
    %12 = tpu.iota {dimensions = array<i32: 1>} : vector<8x128xi32>
    %c128_i32 = arith.constant 128 : i32
    %13 = vector.broadcast %c128_i32 : i32 to vector<8x128xi32>
    %14 = arith.muli %11, %13 : vector<8x128xi32>
    %15 = vector.broadcast %10 : i32 to vector<8x128xi32>
    %16 = arith.addi %15, %14 : vector<8x128xi32>
    %17 = arith.addi %16, %12 : vector<8x128xi32>
    %c16_i32 = arith.constant 16 : i32
    %18 = vector.broadcast %c16_i32 : i32 to vector<8x128xi32>
    %19 = arith.shrui %17, %18 : vector<8x128xi32>
    %20 = arith.xori %17, %19 : vector<8x128xi32>
    %c2146121005_i32 = arith.constant 2146121005 : i32
    %21 = vector.broadcast %c2146121005_i32 : i32 to vector<8x128xi32>
    %22 = arith.muli %20, %21 : vector<8x128xi32>
    %c15_i32 = arith.constant 15 : i32
    %23 = vector.broadcast %c15_i32 : i32 to vector<8x128xi32>
    %24 = arith.shrui %22, %23 : vector<8x128xi32>
    %25 = arith.xori %22, %24 : vector<8x128xi32>
    %c-2073254261_i32 = arith.constant -2073254261 : i32
    %26 = vector.broadcast %c-2073254261_i32 : i32 to vector<8x128xi32>
    %27 = arith.muli %25, %26 : vector<8x128xi32>
    %c16_i32_7 = arith.constant 16 : i32
    %28 = vector.broadcast %c16_i32_7 : i32 to vector<8x128xi32>
    %29 = arith.shrui %27, %28 : vector<8x128xi32>
    %30 = arith.xori %27, %29 : vector<8x128xi32>
    %c1_i32 = arith.constant 1 : i32
    %31 = vector.broadcast %c1_i32 : i32 to vector<8x128xi32>
    %32 = arith.andi %30, %31 : vector<8x128xi32>
    %c1_i32_8 = arith.constant 1 : i32
    %33 = vector.broadcast %c1_i32_8 : i32 to vector<8x128xi32>
    %34 = arith.cmpi eq, %32, %33 : vector<8x128xi32>
    %cst_9 = arith.constant 2.000000e+00 : f32
    %35 = vector.broadcast %cst_9 : f32 to vector<8x128xf32>
    %36 = arith.mulf %7, %35 : vector<8x128xf32>
    %cst_10 = arith.constant 0.000000e+00 : f32
    %37 = vector.broadcast %cst_10 : f32 to vector<8x128xf32>
    %38 = arith.select %34, %36, %37 : vector<8x128xi1>, vector<8x128xf32>
    %c0_11 = arith.constant 0 : index
    %c0_12 = arith.constant 0 : index
    %39 = vector.load %arg5[%c0_11, %c0_12] : memref<128x128xf32, #tpu.memory_space<vmem>>, vector<128x128xf32>
    %cst_13 = arith.constant dense<0.000000e+00> : vector<8x128xf32>
    %40 = tpu.matmul %38, %39, %cst_13 {dimension_numbers = #tpu.dot_dimension_numbers<[1], [0], [0], [1], [0, 0, 1, 1], [], []>} : vector<8x128xf32>, vector<128x128xf32>, vector<8x128xf32> -> vector<8x128xf32>
    %c0_14 = arith.constant 0 : index
    %c0_15 = arith.constant 0 : index
    %41 = vector.load %arg6[%c0_14, %c0_15] : memref<1x128xf32, #tpu.memory_space<vmem>>, vector<1x128xf32>
    %42 = vector.broadcast %41 : vector<1x128xf32> to vector<8x128xf32>
    %43 = arith.addf %40, %42 : vector<8x128xf32>
    %cst_16 = arith.constant 0.000000e+00 : f32
    %44 = vector.broadcast %cst_16 : f32 to vector<8x128xf32>
    %45 = arith.maximumf %43, %44 : vector<8x128xf32>
    %c0_17 = arith.constant 0 : index
    %c0_18 = arith.constant 0 : index
    %46 = vector.load %arg7[%c0_17, %c0_18] : memref<128x128xf32, #tpu.memory_space<vmem>>, vector<128x128xf32>
    %cst_19 = arith.constant dense<0.000000e+00> : vector<8x128xf32>
    %47 = tpu.matmul %45, %46, %cst_19 {dimension_numbers = #tpu.dot_dimension_numbers<[1], [0], [0], [1], [0, 0, 1, 1], [], []>} : vector<8x128xf32>, vector<128x128xf32>, vector<8x128xf32> -> vector<8x128xf32>
    %c0_20 = arith.constant 0 : index
    %c0_21 = arith.constant 0 : index
    %48 = vector.load %arg8[%c0_20, %c0_21] : memref<1x128xf32, #tpu.memory_space<vmem>>, vector<1x128xf32>
    %49 = vector.broadcast %48 : vector<1x128xf32> to vector<8x128xf32>
    %50 = arith.addf %47, %49 : vector<8x128xf32>
    %c0_22 = arith.constant 0 : index
    %c0_23 = arith.constant 0 : index
    %51 = vector.load %arg9[%c0_22, %c0_23] : memref<8x128xf32, #tpu.memory_space<vmem>>, vector<8x128xf32>
    tpu.vector_store %arg9[%c0_22, %c0_23], %50 {strides = array<i32>} : memref<8x128xf32, #tpu.memory_space<vmem>>, vector<8x128xf32>,
    return
  }
  func.func @transform_0(%arg0: i32, %arg1: memref<1xi32, #tpu.memory_space<smem>>) -> (i32, i32) {
    %c0_i32 = arith.constant 0 : i32
    %c0_i32_0 = arith.constant 0 : i32
    return %arg0, %c0_i32 : i32, i32
  }
  func.func @transform_1(%arg0: i32, %arg1: memref<1xi32, #tpu.memory_space<smem>>) -> (i32, i32) {
    %c0_i32 = arith.constant 0 : i32
    %c0_i32_0 = arith.constant 0 : i32
    %c0_i32_1 = arith.constant 0 : i32
    return %c0_i32, %c0_i32_0 : i32, i32
  }
  func.func @transform_2(%arg0: i32, %arg1: memref<1xi32, #tpu.memory_space<smem>>) -> (i32, i32) {
    %c0_i32 = arith.constant 0 : i32
    %c0_i32_0 = arith.constant 0 : i32
    %c0_i32_1 = arith.constant 0 : i32
    return %c0_i32, %c0_i32_0 : i32, i32
  }
  func.func @transform_3(%arg0: i32, %arg1: memref<1xi32, #tpu.memory_space<smem>>) -> (i32, i32) {
    %c0_i32 = arith.constant 0 : i32
    %c0_i32_0 = arith.constant 0 : i32
    %c0_i32_1 = arith.constant 0 : i32
    return %c0_i32, %c0_i32_0 : i32, i32
  }
  func.func @transform_4(%arg0: i32, %arg1: memref<1xi32, #tpu.memory_space<smem>>) -> (i32, i32) {
    %c0_i32 = arith.constant 0 : i32
    %c0_i32_0 = arith.constant 0 : i32
    %c0_i32_1 = arith.constant 0 : i32
    return %c0_i32, %c0_i32_0 : i32, i32
  }
  func.func @transform_5(%arg0: i32, %arg1: memref<1xi32, #tpu.memory_space<smem>>) -> (i32, i32) {
    %c0_i32 = arith.constant 0 : i32
    %c0_i32_0 = arith.constant 0 : i32
    %c0_i32_1 = arith.constant 0 : i32
    return %c0_i32, %c0_i32_0 : i32, i32
  }
  func.func @transform_6(%arg0: i32, %arg1: memref<1xi32, #tpu.memory_space<smem>>) -> (i32, i32) {
    %c0_i32 = arith.constant 0 : i32
    %c0_i32_0 = arith.constant 0 : i32
    %c0_i32_1 = arith.constant 0 : i32
    return %c0_i32, %c0_i32_0 : i32, i32
  }
  func.func @transform_7(%arg0: i32, %arg1: memref<1xi32, #tpu.memory_space<smem>>) -> (i32, i32) {
    %c0_i32 = arith.constant 0 : i32
    %c0_i32_0 = arith.constant 0 : i32
    return %arg0, %c0_i32 : i32, i32
  }
}

</mosaic_0001>

<bundles_post_ra>
// kernel: mlp_forward.1
= control target key start
LH: loop header
LB: loop body
LE: loop exit
PB: predicated region body
PF: predicated region fallthrough
CT: control target
= control target key end

     0   :  { %s431_s0 = inlined_call_operand.<no memory space> [shape: s32[1], index: 0, kind: input, shape index: {}]   ;;  %s432_s1 = inlined_call_operand.vmem [shape: f32[8,128], index: 1, kind: input, shape index: {}]   ;;  %s433_s2 = inlined_call_operand.vmem [shape: f32[128,128], index: 2, kind: input, shape index: {}]   ;;  %s434_s3 = inlined_call_operand.vmem [shape: f32[1,128], index: 3, kind: input, shape index: {}]   ;;  %s435_s4 = inlined_call_operand.vmem [shape: f32[128,128], index: 4, kind: input, shape index: {}]   ;;  %s436_s5 = inlined_call_operand.vmem [shape: f32[1,128], index: 5, kind: input, shape index: {}]   ;;  %s437_s6 = inlined_call_operand.vmem [shape: f32[128,128], index: 6, kind: input, shape index: {}]   ;;  %s438_s7 = inlined_call_operand.vmem [shape: f32[1,128], index: 7, kind: input, shape index: {}]   ;;  %s439_s8 = inlined_call_operand.hbm [shape: f32[8,128], index: 8, kind: output, shape index: {}]  }
   0x1   :  { %v45_v0 = vld [vmem:[%s433_s2 + $0x78] sm:$0xff]  ;;  %v44_v1 = vld [vmem:[%s433_s2 + $0x70] sm:$0xff]  ;;  %v43_v2 = vld [vmem:[%s433_s2 + $0x68] sm:$0xff] }
   0x2   :  { %50 = vmatpush.msra.mxu0 %v45_v0  ;;  %v42_v3 = vld [vmem:[%s433_s2 + $0x60] sm:$0xff]  ;;  %v109_v4 = vld [vmem:[%s435_s4 + $0x78] sm:$0xff]  ;;  %v108_v6 = vld [vmem:[%s435_s4 + $0x70] sm:$0xff] }
   0x3   :  { %v41_v5 = vld [vmem:[%s433_s2 + $0x58] sm:$0xff]  ;;  %114 = vmatpush.msra.mxu1 %v109_v4  ;;  %v107_v7 = vld [vmem:[%s435_s4 + $0x68] sm:$0xff]  ;;  %v40_v8 = vld [vmem:[%s433_s2 + $0x50] sm:$0xff] }
   0x4   :  { %51 = vmatpush.msra.mxu0 %v44_v1  ;;  %v106_v9 = vld [vmem:[%s435_s4 + $0x60] sm:$0xff]  ;;  %v39_v10 = vld [vmem:[%s433_s2 + $0x48] sm:$0xff]  ;;  %v105_v11 = vld [vmem:[%s435_s4 + $0x58] sm:$0xff] }
   0x5   :  { %115 = vmatpush.msra.mxu1 %v108_v6 }
   0x6   :  { %52 = vmatpush.msra.mxu0 %v43_v2 }
   0x7   :  { %116 = vmatpush.msra.mxu1 %v107_v7 }
   0x8   :  { %53 = vmatpush.msra.mxu0 %v42_v3 }
   0xa   :  { %54 = vmatpush.msra.mxu0 %v41_v5 }
   0xc   :  { %55 = vmatpush.msra.mxu0 %v40_v8 }
   0xd   :  { %14 = vsyncpa [#allocation5], 0  ;;  %v38_v12 = vld [vmem:[%s433_s2 + $0x40] sm:$0xff]  ;;  %117 = vmatpush.msra.mxu1 %v106_v9  ;;  %v104_v13 = vld [vmem:[%s435_s4 + $0x50] sm:$0xff]  ;;  %v74_v29 = vlaneseq  ;;  %v79_v32 = vstv %s431_s0  ;;  %s223_s14 = smov [#allocation4]   ;;  %s183_s18 = sshll.u32 %s439_s8, 4  ;;  %s184_s18 = int_to_ptr.hbm [resolvable:$true] %s183_s18 }
   0xe   :  { %56 = vmatpush.msra.mxu0 %v39_v10  ;;  %v37_v14 = vld [vmem:[%s433_s2 + $0x38] sm:$0xff]  ;;  %v103_v15 = vld [vmem:[%s435_s4 + $0x48] sm:$0xff]  ;;  %v36_v16 = vld [vmem:[%s433_s2 + $0x30] sm:$0xff]  ;;  %s181_s15 = sshll.u32 %s223_s14, 4  ;;  %s182_s15 = int_to_ptr.vmem [resolvable:$true] %s181_s15 }
   0xf   :  { %118 = vmatpush.msra.mxu1 %v105_v11  ;;  %v102_v17 = vld [vmem:[%s435_s4 + $0x40] sm:$0xff]  ;;  %v35_v18 = vld [vmem:[%s433_s2 + $0x28] sm:$0xff]  ;;  %v101_v19 = vld [vmem:[%s435_s4 + $0x38] sm:$0xff]  ;;  %v75_v30 = vshrl.u32 %v74_v29, 7  ;;  %v77_v33 = vand.u32 127, %v74_v29 }
  0x10   :  { %57 = vmatpush.msra.mxu0 %v38_v12  ;;  %v34_v20 = vld [vmem:[%s433_s2 + $0x20] sm:$0xff]  ;;  %v100_v21 = vld [vmem:[%s435_s4 + $0x30] sm:$0xff]  ;;  %v33_v22 = vld [vmem:[%s433_s2 + $0x18] sm:$0xff] }
  0x11   :  { %119 = vmatpush.msra.mxu1 %v104_v13  ;;  %v99_v23 = vld [vmem:[%s435_s4 + $0x28] sm:$0xff]  ;;  %v32_v24 = vld [vmem:[%s433_s2 + $0x10] sm:$0xff]  ;;  %v98_v25 = vld [vmem:[%s435_s4 + $0x20] sm:$0xff]  ;;  %v78_v31 = vmul.u32 128, %v75_v30 }
  0x12   :  { %58 = vmatpush.msra.mxu0 %v37_v14  ;;  %v31_v26 = vld [vmem:[%s433_s2 + $0x8] sm:$0xff]  ;;  %v30_v27 = vld [vmem:[%s433_s2] sm:$0xff]  ;;  %v97_v36 = vld [vmem:[%s435_s4 + $0x18] sm:$0xff] }
  0x13   :  { %120 = vmatpush.msra.mxu1 %v103_v15  ;;  %v29_v28 = vld [vmem:[%s432_s1] sm:$0xff]  ;;  %v80_v34 = vadd.s32 %v79_v32, %v78_v31  ;;  %v96_v38 = vld [vmem:[%s435_s4 + $0x10] sm:$0xff]  ;;  %v95_v39 = vld [vmem:[%s435_s4 + $0x8] sm:$0xff] }
  0x14   :  { %59 = vmatpush.msra.mxu0 %v36_v16  ;;  %v94_v41 = vld [vmem:[%s435_s4] sm:$0xff]  ;;  %v150_v42 = vld [vmem:[%s437_s6 + $0x78] sm:$0xff]  ;;  %v149_v43 = vld [vmem:[%s437_s6 + $0x70] sm:$0xff] }
  0x15   :  { %121 = vmatpush.msra.mxu1 %v102_v17  ;;  %v81_v35 = vadd.s32 %v80_v34, %v77_v33  ;;  %155 = vmatpush.msra.mxu2 %v150_v42  ;;  %v148_v45 = vld [vmem:[%s437_s6 + $0x68] sm:$0xff]  ;;  %v147_v46 = vld [vmem:[%s437_s6 + $0x60] sm:$0xff]  ;;  %v146_v48 = vld [vmem:[%s437_s6 + $0x58] sm:$0xff] }
  0x16   :  { %60 = vmatpush.msra.mxu0 %v35_v18  ;;  %v145_v49 = vld [vmem:[%s437_s6 + $0x50] sm:$0xff]  ;;  %v144_v51 = vld [vmem:[%s437_s6 + $0x48] sm:$0xff]  ;;  %v143_v52 = vld [vmem:[%s437_s6 + $0x40] sm:$0xff] }
  0x17   :  { %122 = vmatpush.msra.mxu1 %v101_v19  ;;  %v82_v37 = vshrl.u32 %v81_v35, 16  ;;  %156 = vmatpush.msra.mxu2 %v149_v43  ;;  %v142_v54 = vld [vmem:[%s437_s6 + $0x38] sm:$0xff]  ;;  %v141_v55 = vld [vmem:[%s437_s6 + $0x30] sm:$0xff]  ;;  %v140_v57 = vld [vmem:[%s437_s6 + $0x28] sm:$0xff] }
  0x18   :  { %61 = vmatpush.msra.mxu0 %v34_v20  ;;  %v139_v58 = vld [vmem:[%s437_s6 + $0x20] sm:$0xff]  ;;  %v138_v61 = vld [vmem:[%s437_s6 + $0x18] sm:$0xff]  ;;  %v137_v3 = vld [vmem:[%s437_s6 + $0x10] sm:$0xff] }
  0x19   :  { %123 = vmatpush.msra.mxu1 %v100_v21  ;;  %v83_v40 = vxor.u32 %v82_v37, %v81_v35  ;;  %157 = vmatpush.msra.mxu2 %v148_v45  ;;  %v194_v60 = vld [vmem:[%s434_s3] ss:$0 sm:$0xff]  ;;  %v136_v4 = vld [vmem:[%s437_s6 + $0x8] sm:$0xff] }
  0x1a   :  { %62 = vmatpush.msra.mxu0 %v33_v22  ;;  %v135_v5 = vld [vmem:[%s437_s6] sm:$0xff] }
  0x1b   :  { %124 = vmatpush.msra.mxu1 %v99_v23  ;;  %v84_v44 = vmul.u32 2146121005, %v83_v40  ;;  %158 = vmatpush.msra.mxu2 %v147_v46  ;;  %v195_v6 = vld [vmem:[%s436_s5] ss:$0 sm:$0xff] }
  0x1c   :  { %63 = vmatpush.msra.mxu0 %v32_v24  ;;  %v196_v10 = vld [vmem:[%s438_s7] ss:$0 sm:$0xff] }
  0x1d   :  { %125 = vmatpush.msra.mxu1 %v98_v25  ;;  %v85_v47 = vshrl.u32 %v84_v44, 15  ;;  %159 = vmatpush.msra.mxu2 %v146_v48 }
  0x1e   :  { %64 = vmatpush.msra.mxu0 %v31_v26 }
  0x1f   :  { %126 = vmatpush.msra.mxu1 %v97_v36  ;;  %v86_v50 = vxor.u32 %v85_v47, %v84_v44  ;;  %160 = vmatpush.msra.mxu2 %v145_v49 }
  0x20   :  { %65 = vmatpush.msra.mxu0 %v30_v27 }
  0x21   :  { %66 = vmatmul.f32.vlgmr.msra.gmra.mxu0 %v29_v28  ;;  %127 = vmatpush.msra.mxu1 %v96_v38  ;;  %v87_v53 = vmul.u32 2221713035, %v86_v50 }
  0x22   :  { %161 = vmatpush.msra.mxu2 %v144_v51 }
  0x23   :  { %128 = vmatpush.msra.mxu1 %v95_v39  ;;  %v88_v56 = vshrl.u32 %v87_v53, 16 }
  0x24   :  { %162 = vmatpush.msra.mxu2 %v143_v52 }
  0x25   :  { %129 = vmatpush.msra.mxu1 %v94_v41  ;;  %v89_v59 = vxor.u32 %v88_v56, %v87_v53 }
  0x26   :  { %163 = vmatpush.msra.mxu2 %v142_v54 }
  0x27   :  { %v90_v63 = vand.u32 1, %v89_v59 }
  0x28   :  { %164 = vmatpush.msra.mxu2 %v141_v55 }
  0x29   :  { %vm91_vm0 = vcmp.eq.s32.totalorder %v90_v63, 1 }
  0x2a   :  { %165 = vmatpush.msra.mxu2 %v140_v57 }
  0x2c   :  { %166 = vmatpush.msra.mxu2 %v139_v58 }
  0x2e   :  { %167 = vmatpush.msra.mxu2 %v138_v61 }
  0x30   :  { %168 = vmatpush.msra.mxu2 %v137_v3 }
  0x32   :  { %169 = vmatpush.msra.mxu2 %v136_v4 }
  0x34   :  { %170 = vmatpush.msra.mxu2 %v135_v5 }
  0x9e   :  { %v67_v62 = vpop.f32.mrf.mxu0 }
  0x9f   :  { %v68_v0 = vadd.f32 %v194_v60, %v67_v62 }
  0xa1   :  { %v70_v1 = vmax.f32 %v68_v0, 0.0 }
  0xa3   :  { %v92_v2 = vmul.f32 2.0, %v70_v1 }
  0xa5   :  { %192 = vmatmul.msk.f32.vlgmr.msra.gmra.mxu1 %vm91_vm0, %v92_v2 }
 0x122   :  { %v131_v7 = vpop.f32.mrf.mxu1 }
 0x123   :  { %v132_v8 = vadd.f32 %v195_v6, %v131_v7 }
 0x125   :  { %v134_v9 = vmax.f32 %v132_v8, 0.0 }
 0x127   :  { %171 = vmatmul.f32.vlgmr.msra.gmra.mxu2 %v134_v9 }
 0x1aa   :  { %v172_v11 = vpop.f32.mrf.mxu2 }
 0x1ab   :  { %v173_v12 = vadd.f32 %v196_v10, %v172_v11 }
 0x1ad   :  { %175 = vst [vmem:[#allocation4] sm:$0xff] %v173_v12 }
 0x1ae   :  { %186 = dma.vmem_to_hbm [thread:$0]  %s182_s15, 128, %s184_s18, [#allocation5]  }
 0x1af   :  { %221 = dma.done.wait [#allocation5], 128  }
 0x1b0   :  { %222 = vsyncadd [#allocation5], 4294967168 }
 0x1b1   :  { %191 = vsyncpa [#allocation5], 1 }

</bundles_post_ra>
